<compile_context>
chip_gen: v7x
topology: tpu7x:2x2x1
jax: 0.10.0
libtpu: 0.0.40
codegen_flags: <defaults>
</compile_context>

<pallas_src>
import math

import jax
import jax.numpy as jnp
from jax.experimental import pallas as pl
from jax.experimental.pallas import tpu as pltpu

LOG_STD_MAX = 2.0
LOG_STD_MIN = -5.0

N_OBS = 258              # env.observation_space.shape = (258,)
N_ACT = 2                # env.action_space.shape = (2,)
HIDDEN = 256
K_MAIN = 256             # MXU-friendly part of the fc1 contraction
K_TAIL = N_OBS - K_MAIN  # leftover features handled as a rank-K_TAIL VPU update
DEFAULT_BLOCK_B = 1024   # max batch rows per grid step (sweep 512 / 1024)


def _round_up(x, m):
    return ((x + m - 1) // m) * m


def _choose_tiling(batch, block_batch):
    """Pick (TB, B_pad, n_tiles): padding bounded by < 8*n_tiles rows, and
    >= 2 grid steps for moderately large batches so v7x megacore can shard the
    batch axis across its two TensorCores."""
    n_tiles = max(1, math.ceil(batch / block_batch))
    if n_tiles == 1 and batch >= 256:
        n_tiles = 2
    tb = _round_up(math.ceil(batch / n_tiles), 8)
    return tb, tb * n_tiles, n_tiles


def _actor_kernel(x_ref, w1m_ref, w1t_ref, b1_ref, w2_ref, b2_ref, wh_ref,
                  bh_ref, out_ref):
    # fc1: K=258 split into a clean 256-wide MXU contraction plus a rank-2
    # VPU update, so the MXU never runs a 2/256-useful second pass.
    xm = x_ref[:, :K_MAIN].astype(jnp.bfloat16)
    h1 = jnp.dot(xm, w1m_ref[...], preferred_element_type=jnp.float32)
    xt = x_ref[:, K_MAIN:].astype(jnp.float32)      # (TB, K_TAIL)
    w1t = w1t_ref[...]                              # (K_TAIL, HIDDEN) f32
    for t in range(K_TAIL):                         # unrolled, K_TAIL == 2
        h1 = h1 + xt[:, t:t + 1] * w1t[t:t + 1, :]
    h1 = jnp.maximum(h1 + b1_ref[...], 0.0).astype(jnp.bfloat16)

    # fc2 + relu (bf16 MXU inputs, f32 accumulation; elementwise stays f32 for
    # v5e's f32-only VPU/EUP).
    h2 = jnp.dot(h1, w2_ref[...], preferred_element_type=jnp.float32) + b2_ref[...]
    h2 = jnp.maximum(h2, 0.0).astype(jnp.bfloat16)

    # Fused mean|log_std heads: a single (TB, 2*N_ACT) matmul.
    heads = jnp.dot(h2, wh_ref[...], preferred_element_type=jnp.float32) + bh_ref[...]

    # Apply the log_std squash to every column (tanh on the EUP is nearly free
    # at this width) and select per column, so the merged result is written
    # with a single store into a single output block / DMA stream.
    squashed = LOG_STD_MIN + 0.5 * (LOG_STD_MAX - LOG_STD_MIN) * (jnp.tanh(heads) + 1.0)
    col = jax.lax.broadcasted_iota(jnp.int32, heads.shape, 1)
    out_ref[...] = jnp.where(col < N_ACT, heads, squashed)


def actor_forward(x, params, *, block_batch=DEFAULT_BLOCK_B):
    """x: (B, n_obs) f32 (or bf16). Returns (mean, log_std), each (B, n_act) f32."""
    x = x.reshape(x.shape[0], -1)                    # matches x.view(B, -1)
    B = x.shape[0]
    TB, B_pad, n_tiles = _choose_tiling(B, block_batch)
    if B_pad != B:
        x = jnp.pad(x, ((0, B_pad - B), (0, 0)))

    def resident(shape):
        # Full-extent block, same index every grid step -> loaded into VMEM
        # once and reused across the whole batch sweep.
        # TODO(synk): pipeline_mode=pl.Buffered(1) would single-buffer these
        # constant blocks (~0.6 MiB VMEM + per-step swap bookkeeping saved).
        return pl.BlockSpec(shape, lambda i: (0, 0))

    x_bytes = x.dtype.itemsize * B_pad * N_OBS
    weight_bytes = (2 * (K_MAIN * HIDDEN + HIDDEN * HIDDEN + HIDDEN * 2 * N_ACT)
                    + 4 * K_TAIL * HIDDEN)
    bias_bytes = 4 * (2 * HIDDEN + 2 * N_ACT)
    out_bytes = 4 * B_pad * 2 * N_ACT
    cost = pl.CostEstimate(
        flops=2 * B_pad * (N_OBS * HIDDEN + HIDDEN * HIDDEN + HIDDEN * 2 * N_ACT),
        transcendentals=B_pad * 2 * N_ACT,
        bytes_accessed=x_bytes + weight_bytes + bias_bytes + out_bytes,
    )

    out = pl.pallas_call(
        _actor_kernel,
        out_shape=jax.ShapeDtypeStruct((B_pad, 2 * N_ACT), jnp.float32),
        grid=(n_tiles,),
        in_specs=[
            pl.BlockSpec((TB, N_OBS), lambda i: (i, 0)),   # x: tiled over batch
            resident((K_MAIN, HIDDEN)),                    # w1 main (bf16)
            resident((K_TAIL, HIDDEN)),                    # w1 tail (f32)
            resident((1, HIDDEN)),                         # b1 (f32)
            resident((HIDDEN, HIDDEN)),                    # w2 (bf16)
            resident((1, HIDDEN)),                         # b2 (f32)
            resident((HIDDEN, 2 * N_ACT)),                 # fused head weight (bf16)
            resident((1, 2 * N_ACT)),                      # fused head bias (f32)
        ],
        out_specs=pl.BlockSpec((TB, 2 * N_ACT), lambda i: (i, 0)),
        compiler_params=pltpu.CompilerParams(
            dimension_semantics=("parallel",),             # megacore on v7x
        ),
        cost_estimate=cost,
    )(
        x,
        params["w1m"], params["w1t"], params["b1"],
        params["w2"], params["b2"],
        params["wh"], params["bh"],
    )

    return out[:B, :N_ACT], out[:B, N_ACT:]


def _init_linear(key, fan_in, fan_out):
    """PyTorch nn.Linear default init: U(-1/sqrt(fan_in), 1/sqrt(fan_in)).
    Weight returned already transposed to [in, out]."""
    kw, kb = jax.random.split(key)
    bound = 1.0 / math.sqrt(fan_in)
    w = jax.random.uniform(kw, (fan_in, fan_out), jnp.float32, -bound, bound)
    b = jax.random.uniform(kb, (1, fan_out), jnp.float32, -bound, bound)
    return w, b


def make_params(key):
    k1, k2, k3, k4 = jax.random.split(key, 4)
    w1, b1 = _init_linear(k1, N_OBS, HIDDEN)
    w2, b2 = _init_linear(k2, HIDDEN, HIDDEN)
    wm, bm = _init_linear(k3, HIDDEN, N_ACT)
    wl, bl = _init_linear(k4, HIDDEN, N_ACT)
    # Weights stored in bf16 (halves weight DMA); biases + fc1 tail stay f32.
    return {
        "w1m": w1[:K_MAIN].astype(jnp.bfloat16),   # (256, 256) MXU block
        "w1t": w1[K_MAIN:],                        # (2, 256) rank-2 tail, f32
        "b1": b1,
        "w2": w2.astype(jnp.bfloat16), "b2": b2,
        # mean / log_std heads fused into one (HIDDEN, 2*N_ACT) weight.
        "wh": jnp.concatenate([wm, wl], axis=1).astype(jnp.bfloat16),
        "bh": jnp.concatenate([bm, bl], axis=1),
    }


def actor_forward_ref(x, p):
    """Pure-JAX reference mirroring the kernel's bf16-weight / f32-accum numerics.
    (bf16 weight quantization is an intentional deviation from the f32 PyTorch
    model; use f32 weights end-to-end if exact parity is required.)"""
    x = x.reshape(x.shape[0], -1).astype(jnp.float32)
    h1 = jnp.dot(x[:, :K_MAIN].astype(jnp.bfloat16), p["w1m"],
                 preferred_element_type=jnp.float32)
    h1 = h1 + x[:, K_MAIN:] @ p["w1t"] + p["b1"]
    h1 = jnp.maximum(h1, 0.0)
    h2 = jnp.dot(h1.astype(jnp.bfloat16), p["w2"],
                 preferred_element_type=jnp.float32) + p["b2"]
    h2 = jnp.maximum(h2, 0.0)
    heads = jnp.dot(h2.astype(jnp.bfloat16), p["wh"],
                    preferred_element_type=jnp.float32) + p["bh"]
    mean = heads[:, :N_ACT]
    ls = jnp.tanh(heads[:, N_ACT:])
    ls = LOG_STD_MIN + 0.5 * (LOG_STD_MAX - LOG_STD_MIN) * (ls + 1.0)
    return mean, ls


if __name__ == "__main__":
    key = jax.random.PRNGKey(0)
    k_param, k_x = jax.random.split(key)

    params = make_params(k_param)
    batch = 2
    x = jax.random.normal(k_x, (batch, N_OBS), jnp.float32)

    mean, log_std = actor_forward(x, params)
    mean = jax.block_until_ready(mean)
    log_std = jax.block_until_ready(log_std)

    mean_ref, log_std_ref = actor_forward_ref(x, params)
    assert mean.shape == (batch, N_ACT) and log_std.shape == (batch, N_ACT)
    assert jnp.allclose(mean, mean_ref, atol=1e-2, rtol=1e-2)
    assert jnp.allclose(log_std, log_std_ref, atol=1e-2, rtol=1e-2)
    assert bool(jnp.all(log_std >= LOG_STD_MIN) & jnp.all(log_std <= LOG_STD_MAX))

    print("KERNEL_OK")
</pallas_src>

<mosaic_0001>
module attributes {stable_mosaic.version = 11 : i64} {
  func.func @_actor_kernel(%arg0: i32, %arg1: memref<8x258xf32, #tpu.memory_space<vmem>>, %arg2: memref<256x256xbf16, #tpu.memory_space<vmem>>, %arg3: memref<2x256xf32, #tpu.memory_space<vmem>>, %arg4: memref<1x256xf32, #tpu.memory_space<vmem>>, %arg5: memref<256x256xbf16, #tpu.memory_space<vmem>>, %arg6: memref<1x256xf32, #tpu.memory_space<vmem>>, %arg7: memref<256x4xbf16, #tpu.memory_space<vmem>>, %arg8: memref<1x4xf32, #tpu.memory_space<vmem>>, %arg9: memref<8x4xf32, #tpu.memory_space<vmem>>) attributes {dimension_semantics = [#tpu.dimension_semantics<parallel>], iteration_bounds = array<i64: 1>, scalar_prefetch = 0 : i64, scratch_operands = 0 : i64, tpu.core_type = #tpu.core_type<tc>, window_params = [{transform_indices = @transform_0, window_bounds = array<i64: 8, 258>}, {pipeline_mode = #tpu.pipeline_mode<synchronous>, transform_indices = @transform_1, window_bounds = array<i64: 256, 256>}, {pipeline_mode = #tpu.pipeline_mode<synchronous>, transform_indices = @transform_2, window_bounds = array<i64: 2, 256>}, {pipeline_mode = #tpu.pipeline_mode<synchronous>, transform_indices = @transform_3, window_bounds = array<i64: 1, 256>}, {pipeline_mode = #tpu.pipeline_mode<synchronous>, transform_indices = @transform_4, window_bounds = array<i64: 256, 256>}, {pipeline_mode = #tpu.pipeline_mode<synchronous>, transform_indices = @transform_5, window_bounds = array<i64: 1, 256>}, {pipeline_mode = #tpu.pipeline_mode<synchronous>, transform_indices = @transform_6, window_bounds = array<i64: 256, 4>}, {pipeline_mode = #tpu.pipeline_mode<synchronous>, transform_indices = @transform_7, window_bounds = array<i64: 1, 4>}, {transform_indices = @transform_8, window_bounds = array<i64: 8, 4>}]} {
    %c0 = arith.constant 0 : index
    %c0_0 = arith.constant 0 : index
    %0 = vector.load %arg1[%c0, %c0_0] : memref<8x258xf32, #tpu.memory_space<vmem>>, vector<8x256xf32>
    %1 = arith.truncf %0 : vector<8x256xf32> to vector<8x256xbf16>
    %c0_1 = arith.constant 0 : index
    %c0_2 = arith.constant 0 : index
    %2 = vector.load %arg2[%c0_1, %c0_2] : memref<256x256xbf16, #tpu.memory_space<vmem>>, vector<256x256xbf16>
    %cst = arith.constant dense<0.000000e+00> : vector<8x256xf32>
    %3 = tpu.matmul %1, %2, %cst {dimension_numbers = #tpu.dot_dimension_numbers<[1], [0], [0], [1], [0, 0, 1, 1], [], []>} : vector<8x256xbf16>, vector<256x256xbf16>, vector<8x256xf32> -> vector<8x256xf32>
    %c0_3 = arith.constant 0 : index
    %c256 = arith.constant 256 : index
    %4 = vector.load %arg1[%c0_3, %c256] : memref<8x258xf32, #tpu.memory_space<vmem>>, vector<8x2xf32>
    %c0_4 = arith.constant 0 : index
    %c0_5 = arith.constant 0 : index
    %5 = vector.load %arg3[%c0_4, %c0_5] : memref<2x256xf32, #tpu.memory_space<vmem>>, vector<2x256xf32>
    %6 = vector.extract_strided_slice %4 {offsets = [0, 0], sizes = [8, 1], strides = [1, 1]} : vector<8x2xf32> to vector<8x1xf32>
    %7 = vector.extract_strided_slice %5 {offsets = [0, 0], sizes = [1, 256], strides = [1, 1]} : vector<2x256xf32> to vector<1x256xf32>
    %8 = vector.broadcast %6 : vector<8x1xf32> to vector<8x256xf32>
    %9 = vector.broadcast %7 : vector<1x256xf32> to vector<8x256xf32>
    %10 = arith.mulf %8, %9 : vector<8x256xf32>
    %11 = arith.addf %3, %10 : vector<8x256xf32>
    %12 = vector.extract_strided_slice %4 {offsets = [0, 1], sizes = [8, 1], strides = [1, 1]} : vector<8x2xf32> to vector<8x1xf32>
    %13 = vector.extract_strided_slice %5 {offsets = [1, 0], sizes = [1, 256], strides = [1, 1]} : vector<2x256xf32> to vector<1x256xf32>
    %14 = vector.broadcast %12 : vector<8x1xf32> to vector<8x256xf32>
    %15 = vector.broadcast %13 : vector<1x256xf32> to vector<8x256xf32>
    %16 = arith.mulf %14, %15 : vector<8x256xf32>
    %17 = arith.addf %11, %16 : vector<8x256xf32>
    %c0_6 = arith.constant 0 : index
    %c0_7 = arith.constant 0 : index
    %18 = vector.load %arg4[%c0_6, %c0_7] : memref<1x256xf32, #tpu.memory_space<vmem>>, vector<1x256xf32>
    %19 = vector.broadcast %18 : vector<1x256xf32> to vector<8x256xf32>
    %20 = arith.addf %17, %19 : vector<8x256xf32>
    %cst_8 = arith.constant 0.000000e+00 : f32
    %21 = vector.broadcast %cst_8 : f32 to vector<8x256xf32>
    %22 = arith.maximumf %20, %21 : vector<8x256xf32>
    %23 = arith.truncf %22 : vector<8x256xf32> to vector<8x256xbf16>
    %c0_9 = arith.constant 0 : index
    %c0_10 = arith.constant 0 : index
    %24 = vector.load %arg5[%c0_9, %c0_10] : memref<256x256xbf16, #tpu.memory_space<vmem>>, vector<256x256xbf16>
    %cst_11 = arith.constant dense<0.000000e+00> : vector<8x256xf32>
    %25 = tpu.matmul %23, %24, %cst_11 {dimension_numbers = #tpu.dot_dimension_numbers<[1], [0], [0], [1], [0, 0, 1, 1], [], []>} : vector<8x256xbf16>, vector<256x256xbf16>, vector<8x256xf32> -> vector<8x256xf32>
    %c0_12 = arith.constant 0 : index
    %c0_13 = arith.constant 0 : index
    %26 = vector.load %arg6[%c0_12, %c0_13] : memref<1x256xf32, #tpu.memory_space<vmem>>, vector<1x256xf32>
    %27 = vector.broadcast %26 : vector<1x256xf32> to vector<8x256xf32>
    %28 = arith.addf %25, %27 : vector<8x256xf32>
    %cst_14 = arith.constant 0.000000e+00 : f32
    %29 = vector.broadcast %cst_14 : f32 to vector<8x256xf32>
    %30 = arith.maximumf %28, %29 : vector<8x256xf32>
    %31 = arith.truncf %30 : vector<8x256xf32> to vector<8x256xbf16>
    %c0_15 = arith.constant 0 : index
    %c0_16 = arith.constant 0 : index
    %32 = vector.load %arg7[%c0_15, %c0_16] : memref<256x4xbf16, #tpu.memory_space<vmem>>, vector<256x4xbf16>
    %cst_17 = arith.constant dense<0.000000e+00> : vector<8x4xf32>
    %33 = tpu.matmul %31, %32, %cst_17 {dimension_numbers = #tpu.dot_dimension_numbers<[1], [0], [0], [1], [0, 0, 1, 1], [], []>} : vector<8x256xbf16>, vector<256x4xbf16>, vector<8x4xf32> -> vector<8x4xf32>
    %c0_18 = arith.constant 0 : index
    %c0_19 = arith.constant 0 : index
    %34 = vector.load %arg8[%c0_18, %c0_19] : memref<1x4xf32, #tpu.memory_space<vmem>>, vector<1x4xf32>
    %35 = vector.broadcast %34 : vector<1x4xf32> to vector<8x4xf32>
    %36 = arith.addf %33, %35 : vector<8x4xf32>
    %37 = math.tanh %36 : vector<8x4xf32>
    %cst_20 = arith.constant 1.000000e+00 : f32
    %38 = vector.broadcast %cst_20 : f32 to vector<8x4xf32>
    %39 = arith.addf %37, %38 : vector<8x4xf32>
    %cst_21 = arith.constant 3.500000e+00 : f32
    %40 = vector.broadcast %cst_21 : f32 to vector<8x4xf32>
    %41 = arith.mulf %40, %39 : vector<8x4xf32>
    %cst_22 = arith.constant -5.000000e+00 : f32
    %42 = vector.broadcast %cst_22 : f32 to vector<8x4xf32>
    %43 = arith.addf %42, %41 : vector<8x4xf32>
    %44 = tpu.iota {dimensions = array<i32: 1>} : vector<8x4xi32>
    %c2_i32 = arith.constant 2 : i32
    %45 = vector.broadcast %c2_i32 : i32 to vector<8x4xi32>
    %46 = arith.cmpi slt, %44, %45 : vector<8x4xi32>
    %47 = arith.select %46, %36, %43 : vector<8x4xi1>, vector<8x4xf32>
    %c0_23 = arith.constant 0 : index
    %c0_24 = arith.constant 0 : index
    %48 = vector.load %arg9[%c0_23, %c0_24] : memref<8x4xf32, #tpu.memory_space<vmem>>, vector<8x4xf32>
    tpu.vector_store %arg9[%c0_23, %c0_24], %47 {strides = array<i32>} : memref<8x4xf32, #tpu.memory_space<vmem>>, vector<8x4xf32>,
    return
  }
  func.func @transform_0(%arg0: i32) -> (i32, i32) {
    %c0_i32 = arith.constant 0 : i32
    %c0_i32_0 = arith.constant 0 : i32
    return %arg0, %c0_i32 : i32, i32
  }
  func.func @transform_1(%arg0: i32) -> (i32, i32) {
    %c0_i32 = arith.constant 0 : i32
    %c0_i32_0 = arith.constant 0 : i32
    %c0_i32_1 = arith.constant 0 : i32
    return %c0_i32, %c0_i32_0 : i32, i32
  }
  func.func @transform_2(%arg0: i32) -> (i32, i32) {
    %c0_i32 = arith.constant 0 : i32
    %c0_i32_0 = arith.constant 0 : i32
    %c0_i32_1 = arith.constant 0 : i32
    return %c0_i32, %c0_i32_0 : i32, i32
  }
  func.func @transform_3(%arg0: i32) -> (i32, i32) {
    %c0_i32 = arith.constant 0 : i32
    %c0_i32_0 = arith.constant 0 : i32
    %c0_i32_1 = arith.constant 0 : i32
    return %c0_i32, %c0_i32_0 : i32, i32
  }
  func.func @transform_4(%arg0: i32) -> (i32, i32) {
    %c0_i32 = arith.constant 0 : i32
    %c0_i32_0 = arith.constant 0 : i32
    %c0_i32_1 = arith.constant 0 : i32
    return %c0_i32, %c0_i32_0 : i32, i32
  }
  func.func @transform_5(%arg0: i32) -> (i32, i32) {
    %c0_i32 = arith.constant 0 : i32
    %c0_i32_0 = arith.constant 0 : i32
    %c0_i32_1 = arith.constant 0 : i32
    return %c0_i32, %c0_i32_0 : i32, i32
  }
  func.func @transform_6(%arg0: i32) -> (i32, i32) {
    %c0_i32 = arith.constant 0 : i32
    %c0_i32_0 = arith.constant 0 : i32
    %c0_i32_1 = arith.constant 0 : i32
    return %c0_i32, %c0_i32_0 : i32, i32
  }
  func.func @transform_7(%arg0: i32) -> (i32, i32) {
    %c0_i32 = arith.constant 0 : i32
    %c0_i32_0 = arith.constant 0 : i32
    %c0_i32_1 = arith.constant 0 : i32
    return %c0_i32, %c0_i32_0 : i32, i32
  }
  func.func @transform_8(%arg0: i32) -> (i32, i32) {
    %c0_i32 = arith.constant 0 : i32
    %c0_i32_0 = arith.constant 0 : i32
    return %arg0, %c0_i32 : i32, i32
  }
}

</mosaic_0001>

<bundles_post_ra>
// kernel: tpu_custom_call.1
= control target key start
LH: loop header
LB: loop body
LE: loop exit
PB: predicated region body
PF: predicated region fallthrough
CT: control target
= control target key end

     0   :  { %13 = vsyncpa [#allocation3], 0  ;;  %s1229_s0 = inlined_call_operand.vmem [shape: f32[8,258], index: 0, kind: input, shape index: {}]   ;;  %s1230_s1 = inlined_call_operand.hbm [shape: bf16[256,256], index: 1, kind: input, shape index: {}]   ;;  %s1231_s2 = inlined_call_operand.vmem [shape: f32[2,256], index: 2, kind: input, shape index: {}]   ;;  %s1232_s3 = inlined_call_operand.vmem [shape: f32[1,256], index: 3, kind: input, shape index: {}]   ;;  %s1233_s4 = inlined_call_operand.hbm [shape: bf16[256,256], index: 4, kind: input, shape index: {}]   ;;  %s1234_s5 = inlined_call_operand.vmem [shape: f32[1,256], index: 5, kind: input, shape index: {}]   ;;  %s1235_s6 = inlined_call_operand.vmem [shape: bf16[256,4], index: 6, kind: input, shape index: {}]   ;;  %s1236_s7 = inlined_call_operand.vmem [shape: f32[1,4], index: 7, kind: input, shape index: {}]   ;;  %s1237_s8 = inlined_call_operand.vmem [shape: f32[8,4], index: 8, kind: output, shape index: {}]  }
   0x1   :  { %14 = vsyncpa [#allocation5], 0  ;;  %s1080_s27 = smov [#allocation2]   ;;  %s1032_s9 = scalar_lea.hbm %s1230_s1, 4096 }
   0x2   :  { %s22_s28 = sshll.u32 %s1080_s27, 4  ;;  %p1033_p0 = scmp.ne.s32.totalorder %s1230_s1, %s1032_s9  ;;  %s23_s28 = int_to_ptr.vmem [resolvable:$true] %s22_s28 }
   0x3   :  { %p1036_p1 = scmp.lt.u32.totalorder %s1032_s9, %s1230_s1 }
   0x5   :  { %p1038_p2 = pnand %p1036_p1, %p1033_p0 }
   0x7   :  { %1041 = shalt.err (!%p1038_p2)
}
   0x8   :  { %s1042_s14 = scalar_lea.vmem %s23_s28, 4096  ;;  %p1047_p4 = scmp.lt.s32.totalorder %s23_s28, %s23_s28 }
   0x9   :  { %p1043_p3 = scmp.ne.s32.totalorder %s23_s28, %s1042_s14  ;;  %p1048_p5 = scmp.lt.s32.totalorder %s1042_s14, %s1042_s14 }
   0xb   :  { %p1049_p6 = por %p1048_p5, %p1047_p4 }
   0xd   :  { %p1050_p7 = pnand %p1049_p6, %p1043_p3 }
   0xf   :  { %1053 = shalt.err (!%p1050_p7)
}
  0x10   :  { %s1081_s15 = smov 128   ;;  %s1082_s16 = smov 8  }
  0x11   :  { %28 = dma.hbm_to_vmem [thread:$0]  %s1230_s1, 4096, %s23_s28, [#allocation3], %s1081_s15, %s1081_s15, %s1082_s16  }
  0x12   :  { %s1083_s19 = smov [#allocation4]   ;;  %s1054_s23 = scalar_lea.hbm %s1233_s4, 4096 }
  0x13   :  { %s38_s20 = sshll.u32 %s1083_s19, 4  ;;  %p1055_p8 = scmp.ne.s32.totalorder %s1233_s4, %s1054_s23  ;;  %s39_s20 = int_to_ptr.vmem [resolvable:$true] %s38_s20 }
  0x14   :  { %p1058_p9 = scmp.lt.u32.totalorder %s1054_s23, %s1233_s4 }
  0x16   :  { %p1060_p10 = pnand %p1058_p9, %p1055_p8 }
  0x18   :  { %1063 = shalt.err (!%p1060_p10)
}
  0x19   :  { %s1064_s29 = scalar_lea.vmem %s39_s20, 4096  ;;  %p1069_p12 = scmp.lt.s32.totalorder %s39_s20, %s39_s20 }
  0x1a   :  { %p1065_p11 = scmp.ne.s32.totalorder %s39_s20, %s1064_s29  ;;  %p1070_p13 = scmp.lt.s32.totalorder %s1064_s29, %s1064_s29 }
  0x1c   :  { %p1071_p0 = por %p1070_p13, %p1069_p12 }
  0x1e   :  { %p1072_p1 = pnand %p1071_p0, %p1065_p11 }
  0x20   :  { %1075 = shalt.err (!%p1072_p1)
}
  0x21   :  { %44 = dma.hbm_to_vmem [thread:$0]  %s1233_s4, 4096, %s39_s20, [#allocation5], %s1081_s15, %s1081_s15, %s1082_s16  }
  0x22   :  { %1076 = dma.done.wait [#allocation3], 4096  }
  0x23   :  { %1077 = vsyncadd [#allocation3], 4294963200 }
  0x24   :  { %1078 = dma.done.wait [#allocation5], 4096  }
  0x25   :  { %1079 = vsyncadd [#allocation5], 4294963200  ;;  %v1084_v0 = vmov 0   ;;  %v918_v1 = vld [vmem:[#allocation2 + $0x4] ss:$8 sps:$4 sm:$0xff]   ;;  %v94_v17 = vld [vmem:[%s1229_s0 + $0x10] sm:$0xff] }
  0x26   :  { %916 = vset.pattern.permute.xlu0 %v1084_v0  ;;  %v920_v2 = vld [vmem:[#allocation2] ss:$8 sps:$4 sm:$0xff]   ;;  %282 = vmatprep.subr.bf16.mxu0 %v918_v1  ;;  %v921_v3 = vld [vmem:[#allocation2 + $0x14] ss:$8 sps:$4 sm:$0xff]   ;;  %v923_v4 = vld [vmem:[#allocation2 + $0x10] ss:$8 sps:$4 sm:$0xff]  }
  0x27   :  { %283 = vmatpush1.bf16.msra.mxu0 %v920_v2  ;;  %v924_v5 = vld [vmem:[#allocation2 + $0x24] ss:$8 sps:$4 sm:$0xff]   ;;  %v926_v6 = vld [vmem:[#allocation2 + $0x20] ss:$8 sps:$4 sm:$0xff]   ;;  %v927_v7 = vld [vmem:[#allocation2 + $0x34] ss:$8 sps:$4 sm:$0xff]   ;;  %98 = vperm.xlu0 %916, %v94_v17  }
  0x28   :  { %284 = vmatprep.subr.bf16.mxu0 %v921_v3  ;;  %v929_v8 = vld [vmem:[#allocation2 + $0x30] ss:$8 sps:$4 sm:$0xff]   ;;  %v930_v9 = vld [vmem:[#allocation2 + $0x44] ss:$8 sps:$4 sm:$0xff]   ;;  %v932_v10 = vld [vmem:[#allocation2 + $0x40] ss:$8 sps:$4 sm:$0xff]  }
  0x29   :  { %v933_v11 = vld [vmem:[#allocation2 + $0x54] ss:$8 sps:$4 sm:$0xff]   ;;  %v935_v12 = vld [vmem:[#allocation2 + $0x50] ss:$8 sps:$4 sm:$0xff]   ;;  %v936_v13 = vld [vmem:[#allocation2 + $0x64] ss:$8 sps:$4 sm:$0xff]  }
  0x2a   :  { %v938_v14 = vld [vmem:[#allocation2 + $0x60] ss:$8 sps:$4 sm:$0xff]   ;;  %v966_v18 = vld [vmem:[#allocation4 + $0x4] ss:$8 sps:$4 sm:$0xff]   ;;  %v939_v20 = vld [vmem:[#allocation2 + $0x74] ss:$8 sps:$4 sm:$0xff]  }
  0x2b   :  { %285 = vmatpush1.bf16.msra.mxu0 %v923_v4  ;;  %v59_v15 = vld [vmem:[%s1229_s0 + $0x8] sm:$0xff]  ;;  %571 = vmatprep.subr.bf16.mxu1 %v966_v18  ;;  %v969_v21 = vld [vmem:[#allocation4 + $0x14] ss:$8 sps:$4 sm:$0xff]   ;;  %v971_v22 = vld [vmem:[#allocation4 + $0x10] ss:$8 sps:$4 sm:$0xff]   ;;  %v1085_v24 = vmov 1  }
  0x2c   :  { %286 = vmatprep.subr.bf16.mxu0 %v924_v5  ;;  %v61_v16 = vpack.c.bf16 %v59_v15, %v59_v15  ;;  %v968_v19 = vld [vmem:[#allocation4] ss:$8 sps:$4 sm:$0xff]   ;;  %v941_v23 = vld [vmem:[#allocation2 + $0x70] ss:$8 sps:$4 sm:$0xff]   ;;  %917 = vset.pattern.permute.xlu0 %v1085_v24  ;;  %v972_v25 = vld [vmem:[#allocation4 + $0x24] ss:$8 sps:$4 sm:$0xff]  }
  0x2d   :  { %572 = vmatpush1.bf16.msra.mxu1 %v968_v19  ;;  %v942_v26 = vld [vmem:[#allocation2 + $0x84] ss:$8 sps:$4 sm:$0xff]   ;;  %324 = vperm.xlu0 %917, %v94_v17   ;;  %v974_v27 = vld [vmem:[#allocation4 + $0x20] ss:$8 sps:$4 sm:$0xff]   ;;  %v975_v29 = vld [vmem:[#allocation4 + $0x34] ss:$8 sps:$4 sm:$0xff]   ;;  %v102_v19 = vlaneseq }
  0x2e   :  { %314 = vmatprep.mubr.bf16.mxu0 %v61_v16  ;;  %573 = vmatprep.subr.bf16.mxu1 %v969_v21  ;;  %v944_v28 = vld [vmem:[#allocation2 + $0x80] ss:$8 sps:$4 sm:$0xff]   ;;  %v945_v30 = vld [vmem:[#allocation2 + $0x94] ss:$8 sps:$4 sm:$0xff]   ;;  %v977_v31 = vld [vmem:[#allocation4 + $0x30] ss:$8 sps:$4 sm:$0xff]  }
  0x2f   :  { %287 = vmatpush1.bf16.msra.mxu0 %v926_v6  ;;  %v947_v32 = vld [vmem:[#allocation2 + $0x90] ss:$8 sps:$4 sm:$0xff]   ;;  %v978_v33 = vld [vmem:[#allocation4 + $0x44] ss:$8 sps:$4 sm:$0xff]   ;;  %v950_v35 = vld [vmem:[#allocation2 + $0xa0] ss:$8 sps:$4 sm:$0xff]  }
  0x30   :  { %288 = vmatprep.subr.bf16.mxu0 %v927_v7  ;;  %v948_v34 = vld [vmem:[#allocation2 + $0xa4] ss:$8 sps:$4 sm:$0xff]   ;;  %v980_v36 = vld [vmem:[#allocation4 + $0x40] ss:$8 sps:$4 sm:$0xff]   ;;  %v951_v37 = vld [vmem:[#allocation2 + $0xb4] ss:$8 sps:$4 sm:$0xff]  }
  0x31   :  { %574 = vmatpush1.bf16.msra.mxu1 %v971_v22  ;;  %v981_v38 = vld [vmem:[#allocation4 + $0x54] ss:$8 sps:$4 sm:$0xff]   ;;  %v983_v39 = vld [vmem:[#allocation4 + $0x50] ss:$8 sps:$4 sm:$0xff]   ;;  %v984_v41 = vld [vmem:[#allocation4 + $0x64] ss:$8 sps:$4 sm:$0xff]  }
  0x32   :  { %575 = vmatprep.subr.bf16.mxu1 %v972_v25  ;;  %v953_v40 = vld [vmem:[#allocation2 + $0xb0] ss:$8 sps:$4 sm:$0xff]   ;;  %v954_v42 = vld [vmem:[#allocation2 + $0xc4] ss:$8 sps:$4 sm:$0xff]   ;;  %v986_v43 = vld [vmem:[#allocation4 + $0x60] ss:$8 sps:$4 sm:$0xff]  }
  0x33   :  { %289 = vmatpush1.bf16.msra.mxu0 %v929_v8  ;;  %v956_v44 = vld [vmem:[#allocation2 + $0xc0] ss:$8 sps:$4 sm:$0xff]   ;;  %v987_v45 = vld [vmem:[#allocation4 + $0x74] ss:$8 sps:$4 sm:$0xff]   ;;  %v989_v47 = vld [vmem:[#allocation4 + $0x70] ss:$8 sps:$4 sm:$0xff]  }
  0x34   :  { %290 = vmatprep.subr.bf16.mxu0 %v930_v9  ;;  %v957_v46 = vld [vmem:[#allocation2 + $0xd4] ss:$8 sps:$4 sm:$0xff]   ;;  %v959_v48 = vld [vmem:[#allocation2 + $0xd0] ss:$8 sps:$4 sm:$0xff]   ;;  %v990_v49 = vld [vmem:[#allocation4 + $0x84] ss:$8 sps:$4 sm:$0xff]  }
  0x35   :  { %576 = vmatpush1.bf16.msra.mxu1 %v974_v27  ;;  %v960_v50 = vld [vmem:[#allocation2 + $0xe4] ss:$8 sps:$4 sm:$0xff]   ;;  %v992_v51 = vld [vmem:[#allocation4 + $0x80] ss:$8 sps:$4 sm:$0xff]   ;;  %v993_v53 = vld [vmem:[#allocation4 + $0x94] ss:$8 sps:$4 sm:$0xff]  }
  0x36   :  { %577 = vmatprep.subr.bf16.mxu1 %v975_v29  ;;  %v962_v52 = vld [vmem:[#allocation2 + $0xe0] ss:$8 sps:$4 sm:$0xff]   ;;  %v963_v54 = vld [vmem:[#allocation2 + $0xf4] ss:$8 sps:$4 sm:$0xff]   ;;  %v995_v55 = vld [vmem:[#allocation4 + $0x90] ss:$8 sps:$4 sm:$0xff]  }
  0x37   :  { %291 = vmatpush1.bf16.msra.mxu0 %v932_v10  ;;  %v965_v56 = vld [vmem:[#allocation2 + $0xf0] ss:$8 sps:$4 sm:$0xff]   ;;  %v58_v57 = vld [vmem:[%s1229_s0] sm:$0xff]  ;;  %v999_v61 = vld [vmem:[#allocation4 + $0xb4] ss:$8 sps:$4 sm:$0xff]   ;;  %vm799_vm1 = vcmask 31744  }
  0x38   :  { %292 = vmatprep.subr.bf16.mxu0 %v933_v11  ;;  %v996_v58 = vld [vmem:[#allocation4 + $0xa4] ss:$8 sps:$4 sm:$0xff]   ;;  %v60_v59 = vpack.c.bf16 %v58_v57, %v58_v57  ;;  %v998_v60 = vld [vmem:[#allocation4 + $0xa0] ss:$8 sps:$4 sm:$0xff]   ;;  %v1001_v62 = vld [vmem:[#allocation4 + $0xb0] ss:$8 sps:$4 sm:$0xff]  }
  0x39   :  { %578 = vmatpush1.bf16.msra.mxu1 %v977_v31  ;;  %v1002_v63 = vld [vmem:[#allocation4 + $0xc4] ss:$8 sps:$4 sm:$0xff]   ;;  %v1004_v0 = vld [vmem:[#allocation4 + $0xc0] ss:$8 sps:$4 sm:$0xff]   ;;  %v1005_v1 = vld [vmem:[#allocation4 + $0xd4] ss:$8 sps:$4 sm:$0xff]  }
  0x3a   :  { %579 = vmatprep.subr.bf16.mxu1 %v978_v33  ;;  %v1007_v2 = vld [vmem:[#allocation4 + $0xd0] ss:$8 sps:$4 sm:$0xff]   ;;  %v1008_v3 = vld [vmem:[#allocation4 + $0xe4] ss:$8 sps:$4 sm:$0xff]   ;;  %v1010_v4 = vld [vmem:[#allocation4 + $0xe0] ss:$8 sps:$4 sm:$0xff]  }
  0x3b   :  { %293 = vmatpush1.bf16.msra.mxu0 %v935_v12  ;;  %v1011_v5 = vld [vmem:[#allocation4 + $0xf4] ss:$8 sps:$4 sm:$0xff]   ;;  %v1013_v6 = vld [vmem:[#allocation4 + $0xf0] ss:$8 sps:$4 sm:$0xff]   ;;  %v1014_v7 = vld [vmem:[%s1235_s6 + $0x40] sm:$0xff]  }
  0x3c   :  { %294 = vmatprep.subr.bf16.mxu0 %v936_v13  ;;  %v1015_v8 = vld [vmem:[%s1235_s6] sm:$0xff]   ;;  %v1016_v9 = vld [vmem:[%s1235_s6 + $0x48] sm:$0xff]   ;;  %v1018_v11 = vld [vmem:[%s1235_s6 + $0x50] sm:$0xff]  }
  0x3d   :  { %580 = vmatpush1.bf16.msra.mxu1 %v980_v36  ;;  %v1017_v10 = vld [vmem:[%s1235_s6 + $0x8] sm:$0xff]   ;;  %v1019_v12 = vld [vmem:[%s1235_s6 + $0x10] sm:$0xff]   ;;  %v1020_v13 = vld [vmem:[%s1235_s6 + $0x58] sm:$0xff]  }
  0x3e   :  { %581 = vmatprep.subr.bf16.mxu1 %v981_v38  ;;  %v1022_v15 = vld [vmem:[%s1235_s6 + $0x60] sm:$0xff]   ;;  %v1024_v17 = vld [vmem:[%s1235_s6 + $0x68] sm:$0xff]   ;;  %v1026_v57 = vld [vmem:[%s1235_s6 + $0x70] sm:$0xff]  }
  0x3f   :  { %295 = vmatpush1.bf16.msra.mxu0 %v938_v14  ;;  %v1021_v14 = vld [vmem:[%s1235_s6 + $0x18] sm:$0xff]   ;;  %v1023_v16 = vld [vmem:[%s1235_s6 + $0x20] sm:$0xff]   ;;  %v1025_v18 = vld [vmem:[%s1235_s6 + $0x28] sm:$0xff]  }
  0x40   :  { %296 = vmatprep.subr.bf16.mxu0 %v939_v20  ;;  %v103_v20 = vshrl.u32 %v102_v19, 7  ;;  %v349_v36 = vld [vmem:[%s1232_s3] sm:$0x3] }
  0x41   :  { %582 = vmatpush1.bf16.msra.mxu1 %v983_v39 }
  0x42   :  { %583 = vmatprep.subr.bf16.mxu1 %v984_v41  ;;  %v104_v21 = vsub.s32 0, %v103_v20  ;;  %v329_v22 = vsub.s32 1, %v103_v20  ;;  %v108_v24 = vsub.s32 2, %v103_v20  ;;  %v333_v25 = vsub.s32 3, %v103_v20 }
  0x43   :  { %297 = vmatpush1.bf16.msra.mxu0 %v941_v23  ;;  %v95_v23 = vld [vmem:[%s1231_s2] sm:$0xf] }
  0x44   :  { %298 = vmatprep.subr.bf16.mxu0 %v942_v26  ;;  %v105_v27 = vrot.slane %v95_v23, %v104_v21  ;;  %v109_v29 = vrot.slane %v95_v23, %v108_v24 }
  0x45   :  { %584 = vmatpush1.bf16.msra.mxu1 %v986_v43 }
  0x46   :  { %585 = vmatprep.subr.bf16.mxu1 %v987_v45  ;;  %v115_v31 = vrot.slane %v105_v27, %v104_v21  ;;  %v119_v33 = vrot.slane %v109_v29, %v104_v21 }
  0x47   :  { %299 = vmatpush1.bf16.msra.mxu0 %v944_v28  ;;  %v330_v28 = vrot.slane %v95_v23, %v329_v22 }
  0x48   :  { %300 = vmatprep.subr.bf16.mxu0 %v945_v30  ;;  %v334_v30 = vrot.slane %v95_v23, %v333_v25 }
  0x49   :  { %586 = vmatpush1.bf16.msra.mxu1 %v989_v47  ;;  %v358_v47 = vrot.slane %v349_v36, %v329_v22 }
  0x4a   :  { %587 = vmatprep.subr.bf16.mxu1 %v990_v49 }
  0x4b   :  { %301 = vmatpush1.bf16.msra.mxu0 %v947_v32  ;;  %v340_v32 = vrot.slane %v330_v28, %v329_v22 }
  0x4c   :  { %302 = vmatprep.subr.bf16.mxu0 %v948_v34  ;;  %v344_v34 = vrot.slane %v334_v30, %v329_v22 }
  0x4d   :  { %588 = vmatpush1.bf16.msra.mxu1 %v992_v51 }
  0x4e   :  { %589 = vmatprep.subr.bf16.mxu1 %v993_v53 }
  0x4f   :  { %303 = vmatpush1.bf16.msra.mxu0 %v950_v35 }
  0x50   :  { %304 = vmatprep.subr.bf16.mxu0 %v951_v37 }
  0x51   :  { %590 = vmatpush1.bf16.msra.mxu1 %v995_v55 }
  0x52   :  { %591 = vmatprep.subr.bf16.mxu1 %v996_v58  ;;  %v1027_v58 = vld [vmem:[%s1235_s6 + $0x30] sm:$0xff]  }
  0x53   :  { %305 = vmatpush1.bf16.msra.mxu0 %v953_v40 }
  0x54   :  { %306 = vmatprep.subr.bf16.mxu0 %v954_v42 }
  0x55   :  { %592 = vmatpush1.bf16.msra.mxu1 %v998_v60  ;;  %v1029_v60 = vld [vmem:[%s1235_s6 + $0x38] sm:$0xff]  }
  0x56   :  { %593 = vmatprep.subr.bf16.mxu1 %v999_v61  ;;  %v399_v61 = vld [vmem:[%s1234_s5] sm:$0x3] }
  0x57   :  { %307 = vmatpush1.bf16.msra.mxu0 %v956_v44  ;;  %v354_v44 = vrot.slane %v349_v36, %v104_v21 }
  0x58   :  { %308 = vmatprep.subr.bf16.mxu0 %v957_v46 }
  0x59   :  { %594 = vmatpush1.bf16.msra.mxu1 %v1001_v62  ;;  %v404_v62 = vrot.slane %v399_v61, %v104_v21 }
  0x5a   :  { %595 = vmatprep.subr.bf16.mxu1 %v1002_v63  ;;  %v408_v63 = vrot.slane %v399_v61, %v329_v22 }
  0x5b   :  { %309 = vmatpush1.bf16.msra.mxu0 %v959_v48 }
  0x5c   :  { %310 = vmatprep.subr.bf16.mxu0 %v960_v50 }
  0x5d   :  { %596 = vmatpush1.bf16.msra.mxu1 %v1004_v0 }
  0x5e   :  { %597 = vmatprep.subr.bf16.mxu1 %v1005_v1 }
  0x5f   :  { %311 = vmatpush1.bf16.msra.mxu0 %v962_v52 }
  0x60   :  { %312 = vmatprep.subr.bf16.mxu0 %v963_v54 }
  0x61   :  { %598 = vmatpush1.bf16.msra.mxu1 %v1007_v2 }
  0x62   :  { %599 = vmatprep.subr.bf16.mxu1 %v1008_v3 }
  0x63   :  { %313 = vmatpush1.bf16.msra.mxu0 %v965_v56 }
  0x64   :  { %888 = vmatprep.subr.bf16.mxu0 %v1014_v7 }
  0x65   :  { %600 = vmatpush1.bf16.msra.mxu1 %v1010_v4 }
  0x66   :  { %315 = vmatmul.mubr.bf16.vlgmr.msra.gmra.mrb[0].mxu0 %v60_v59  ;;  %601 = vmatprep.subr.bf16.mxu1 %v1011_v5  ;;  %v1028_v59 = vld [vmem:[%s1235_s6 + $0x78] sm:$0xff]  }
  0x67   :  { %889 = vmatpush3.bf16.msra.mxu0 %v1015_v8 }
  0x68   :  { %890 = vmatprep.subr.bf16.mxu0 %v1016_v9 }
  0x69   :  { %602 = vmatpush1.bf16.msra.mxu1 %v1013_v6 }
  0x6b   :  { %891 = vmatpush3.bf16.msra.mxu0 %v1017_v10 }
  0x6c   :  { %892 = vmatprep.subr.bf16.mxu0 %v1018_v11  ;;  %v871_v11 = vld [vmem:[%s1236_s7] ss:$0 sm:$0xff] }
  0x6f   :  { %893 = vmatpush3.bf16.msra.mxu0 %v1019_v12 }
  0x70   :  { %894 = vmatprep.subr.bf16.mxu0 %v1020_v13 }
  0x73   :  { %895 = vmatpush3.bf16.msra.mxu0 %v1021_v14 }
  0x74   :  { %896 = vmatprep.subr.bf16.mxu0 %v1022_v15 }
  0x77   :  { %897 = vmatpush3.bf16.msra.mxu0 %v1023_v16 }
  0x78   :  { %898 = vmatprep.subr.bf16.mxu0 %v1024_v17 }
  0x7b   :  { %899 = vmatpush3.bf16.msra.mxu0 %v1025_v18  ;;  %v796_v18 = vand.u32 127, %v102_v19 }
  0x7c   :  { %900 = vmatprep.subr.bf16.mxu0 %v1026_v57 }
  0x7d   :  { %vm797_vm0 = vcmp.lt.s32.totalorder %v796_v18, 2 }
  0x7f   :  { %901 = vmatpush3.bf16.msra.mxu0 %v1027_v58 }
  0x80   :  { %902 = vmatprep.subr.bf16.mxu0 %v1028_v59 }
  0x83   :  { %903 = vmatpush3.bf16.msra.mxu0 %v1029_v60 }
  0xa6   :  { %v99_v26 = vpop.permute.xlu0 %98 }
  0xa7   :  { %v120_v37 = vmul.f32 %v115_v31, %v99_v26  ;;  %v121_v39 = vmul.f32 %v119_v33, %v99_v26 }
  0xac   :  { %v325_v35 = vpop.permute.xlu0 %324 }
  0xad   :  { %v345_v38 = vmul.f32 %v340_v32, %v325_v35  ;;  %v346_v40 = vmul.f32 %v344_v34, %v325_v35 }
 0x139   :  { %v316_v41 = vpop.f32.mrb[0].mxu0 }
 0x13a   :  { %v317_v42 = vadd.f32 %v316_v41, %v120_v37  ;;  %v318_v43 = vpop.f32.mrb[1].mxu0 }
 0x13b   :  { %v319_v45 = vadd.f32 %v318_v43, %v121_v39  ;;  %v320_v46 = vpop.f32.mrb[2].mxu0 }
 0x13c   :  { %v347_v48 = vadd.f32 %v345_v38, %v317_v42  ;;  %v321_v49 = vpop.f32.mrb[3].mxu0 }
 0x13d   :  { %v348_v50 = vadd.f32 %v346_v40, %v319_v45 }
 0x13e   :  { %v361_v51 = vadd.f32 %v354_v44, %v347_v48 }
 0x13f   :  { %v362_v52 = vadd.f32 %v358_v47, %v348_v50 }
 0x140   :  { %v363_v53 = vmax.f32 %v361_v51, 0.0 }
 0x141   :  { %v364_v54 = vmax.f32 %v362_v52, 0.0 }
 0x142   :  { %v365_v56 = vpack.c.bf16 %v363_v53, %v363_v53 }
 0x143   :  { %v366_v55 = vpack.c.bf16 %v364_v54, %v364_v54 }
 0x145   :  { %603 = vmatprep.mubr.bf16.mxu1 %v366_v55 }
 0x146   :  { %604 = vmatmul.mubr.bf16.vlgmr.msra.gmra.mrb[0].mxu1 %v365_v56 }
 0x219   :  { %v605_v0 = vpop.f32.mrb[0].mxu1 }
 0x21a   :  { %v606_v1 = vadd.f32 %v605_v0, %v404_v62  ;;  %v607_v2 = vpop.f32.mrb[1].mxu1 }
 0x21b   :  { %v608_v3 = vadd.f32 %v607_v2, %v408_v63  ;;  %v609_v4 = vpop.f32.mrb[2].mxu1 }
 0x21c   :  { %v612_v5 = vmax.f32 %v606_v1, 0.0  ;;  %v610_v6 = vpop.f32.mrb[3].mxu1 }
 0x21d   :  { %v613_v7 = vmax.f32 %v608_v3, 0.0 }
 0x21e   :  { %v614_v9 = vpack.c.bf16 %v612_v5, %v612_v5 }
 0x21f   :  { %v615_v8 = vpack.c.bf16 %v613_v7, %v613_v7 }
 0x221   :  { %783 = vmatprep.mubr.bf16.mxu0 %v615_v8 }
 0x222   :  { %784 = vmatmul.mubr.bf16.vlgmr.msra.gmra.mrb[4].mxu0 %v614_v9 }
 0x2f5   :  { %v904_v10 = vpop.f32.mrb[4].mxu0 }
 0x2f6   :  { %v905_v12 = vpop.f32.mrb[5].mxu0 }
 0x2f7   :  { %v906_v13 = vadd.f32 %v905_v12, %v904_v10  ;;  %v907_v14 = vpop.f32.mrb[6].mxu0 }
 0x2f8   :  { %v908_v15 = vpop.f32.mrb[7].mxu0 }
 0x2f9   :  { %v786_v16 = vadd.f32 %v906_v13, %v871_v11 }
 0x2fb   :  { %1030 = vtanh.f32 %v786_v16 }
 0x305   :  { %v1031_v17 = vpop.eup %1030 }
 0x306   :  { %v792_v20 = vadd.f32 1.0, %v1031_v17 }
 0x308   :  { %v793_v21 = vmul.f32 3.5, %v792_v20 }
 0x30a   :  { %v794_v22 = vadd.f32 -5.0, %v793_v21 }
 0x30c   :  { %v798_v23 = vsel %vm797_vm0, %v786_v16, %v794_v22 }
 0x30d   :  { %800 = vst.msk [vmem:[%s1237_s8] sm:$0xff] %vm799_vm1, %v798_v23 }
 0x30e   :  { %805 = vsyncpa [#allocation3], 1 }
 0x30f   :  { %806 = vsyncpa [#allocation5], 1 }

</bundles_post_ra>
